<compile_context>
chip_gen: v6e
topology: v6e:2x2x1
jax: 0.10.0
libtpu: 0.0.40
codegen_flags: <defaults>
</compile_context>

<pallas_src>
import functools

import jax
import jax.numpy as jnp
from jax.experimental import pallas as pl
from jax.experimental.pallas import tpu as pltpu


def _round_up(a, b):
    return (a + b - 1) // b * b


def _cdiv(a, b):
    return (a + b - 1) // b


def _layernorm_masked(h, gamma, beta, c_true, eps):
    """LayerNorm over the last dim of `h`, using only the first `c_true` lanes.

    Assumes padded lanes of `h` are exactly zero (guaranteed by zero-padded
    weight columns) and padded lanes of gamma/beta are zero, so the affine
    output in padded lanes is exactly zero as well.
    """
    c_pad = h.shape[-1]
    if c_pad == c_true:
        mean = jnp.mean(h, axis=-1, keepdims=True)
        centered = h - mean
        var = jnp.mean(centered * centered, axis=-1, keepdims=True)
    else:
        inv_c = 1.0 / c_true
        lane = jax.lax.broadcasted_iota(jnp.int32, (1, c_pad), 1)
        mask = (lane < c_true).astype(jnp.float32)
        mean = jnp.sum(h, axis=-1, keepdims=True) * inv_c      # pad lanes are 0
        centered = (h - mean) * mask                           # mask pad lanes
        var = jnp.sum(centered * centered, axis=-1, keepdims=True) * inv_c
    normed = (h - mean) * jax.lax.rsqrt(var + eps)
    return normed * gamma + beta


def _mlp_kernel(x_ref, w1_ref, g1_ref, b1_ref, w2_ref, g2_ref, b2_ref, o_ref,
                *, c_mid, c_out, eps, slope):
    # ---- Linear 1 (bias-free): MXU matmul in the input dtype, f32 accumulate.
    h = jnp.dot(x_ref[...], w1_ref[...], preferred_element_type=jnp.float32)

    # ---- LayerNorm over the true mid channels + LeakyReLU(0.3) (f32 math).
    h = _layernorm_masked(h, g1_ref[...].astype(jnp.float32),
                          b1_ref[...].astype(jnp.float32), c_mid, eps)
    h = jnp.where(h >= 0, h, slope * h)

    # ---- Linear 2 (bias-free): back to the weight dtype for the MXU.
    y = jnp.dot(h.astype(w2_ref.dtype), w2_ref[...],
                preferred_element_type=jnp.float32)

    # ---- LayerNorm over the true out channels + LeakyReLU(0.3).
    y = _layernorm_masked(y, g2_ref[...].astype(jnp.float32),
                          b2_ref[...].astype(jnp.float32), c_out, eps)
    y = jnp.where(y >= 0, y, slope * y)

    o_ref[...] = y.astype(o_ref.dtype)


def mlp_leaky(x, w1, g1, b1, w2, g2, b2, *, tile_n=256, eps=1e-5, slope=0.3):
    """x: [N, Cin]; w1: [Cmid, Cin], w2: [Cout, Cmid] (PyTorch Linear layout)."""
    N, c_in = x.shape
    c_mid = w1.shape[0]
    c_out = w2.shape[0]

    dtype = x.dtype
    itemsize = jnp.dtype(dtype).itemsize

    # --- lane-dense padding: channel dims -> multiples of 128 (vreg lane width)
    LANE = 128
    c_in_p = _round_up(c_in, LANE)
    c_mid_p = _round_up(c_mid, LANE)
    c_out_p = _round_up(c_out, LANE)

    # --- batch tiling: biggest tile that makes sense, aligned to sublane packing
    row_align = 8 if itemsize == 4 else 16
    tile = max(row_align, min(int(tile_n), _round_up(N, row_align)))
    tile = _round_up(tile, row_align)
    if _cdiv(N, tile) < 2 and N > row_align:
        # Give v7x's two TensorCores at least one tile each.
        tile = _round_up(_cdiv(N, 2), row_align)
    n_pad = _round_up(N, tile)
    grid = (n_pad // tile,)

    # --- zero-pad operands; zero weight columns keep padded lanes exactly zero
    xp = jnp.pad(x, ((0, n_pad - N), (0, c_in_p - c_in)))
    w1t = jnp.pad(w1.T.astype(dtype), ((0, c_in_p - c_in), (0, c_mid_p - c_mid)))
    w2t = jnp.pad(w2.T.astype(dtype), ((0, c_mid_p - c_mid), (0, c_out_p - c_out)))
    g1r = jnp.pad(g1.reshape(1, c_mid), ((0, 0), (0, c_mid_p - c_mid)))
    b1r = jnp.pad(b1.reshape(1, c_mid), ((0, 0), (0, c_mid_p - c_mid)))
    g2r = jnp.pad(g2.reshape(1, c_out), ((0, 0), (0, c_out_p - c_out)))
    b2r = jnp.pad(b2.reshape(1, c_out), ((0, 0), (0, c_out_p - c_out)))

    kernel = functools.partial(_mlp_kernel, c_mid=c_mid, c_out=c_out,
                               eps=eps, slope=slope)

    # --- VMEM budget: double-buffered x/out tiles + (conservatively 2x) weights
    vmem_est = (2 * (tile * c_in_p + tile * c_out_p)
                + 2 * (c_in_p * c_mid_p + c_mid_p * c_out_p)
                + 4 * (c_mid_p + c_out_p)) * itemsize
    vmem_limit = min(int(vmem_est * 2) + (2 << 20), 96 << 20)

    def build(single_buffer_weights):
        # Grid-invariant operands (weights / LN params) don't need double
        # buffering: their block index never changes.
        const_kw = ({"pipeline_mode": pl.Buffered(1)}
                    if single_buffer_weights else {})
        grid_spec = pl.GridSpec(
            grid=grid,
            in_specs=[
                pl.BlockSpec((tile, c_in_p), lambda i: (i, 0)),            # x
                pl.BlockSpec((c_in_p, c_mid_p), lambda i: (0, 0), **const_kw),
                pl.BlockSpec((1, c_mid_p), lambda i: (0, 0), **const_kw),  # g1
                pl.BlockSpec((1, c_mid_p), lambda i: (0, 0), **const_kw),  # b1
                pl.BlockSpec((c_mid_p, c_out_p), lambda i: (0, 0), **const_kw),
                pl.BlockSpec((1, c_out_p), lambda i: (0, 0), **const_kw),  # g2
                pl.BlockSpec((1, c_out_p), lambda i: (0, 0), **const_kw),  # b2
            ],
            out_specs=pl.BlockSpec((tile, c_out_p), lambda i: (i, 0)),     # lane-dense
        )
        return pl.pallas_call(
            kernel,
            out_shape=jax.ShapeDtypeStruct((n_pad, c_out_p), dtype),
            grid_spec=grid_spec,
            compiler_params=pltpu.CompilerParams(
                dimension_semantics=("parallel",),
                vmem_limit_bytes=vmem_limit),
        )

    try:
        out = build(True)(xp, w1t, g1r, b1r, w2t, g2r, b2r)
    except Exception:
        # Guard for JAX builds where pipeline_mode=pl.Buffered(1) is unsupported.
        out = build(False)(xp, w1t, g1r, b1r, w2t, g2r, b2r)

    return out[:N, :c_out]


def _reference(x, w1, g1, b1, w2, g2, b2, eps=1e-5, slope=0.3):
    def ln(h, g, b):
        m = jnp.mean(h, axis=-1, keepdims=True)
        v = jnp.mean((h - m) ** 2, axis=-1, keepdims=True)
        return (h - m) / jnp.sqrt(v + eps) * g + b

    h = x @ w1.T
    h = ln(h, g1, b1)
    h = jnp.where(h >= 0, h, slope * h)
    y = h @ w2.T
    y = ln(y, g2, b2)
    return jnp.where(y >= 0, y, slope * y)


if __name__ == "__main__":
    # Small shapes consistent with the module (Linear acts on the last dim).
    N, C_IN, C_MID, C_OUT = 16, 32, 48, 24

    key = jax.random.PRNGKey(0)
    kx, kw1, kw2, kg1, kb1, kg2, kb2 = jax.random.split(key, 7)

    x = jax.random.normal(kx, (N, C_IN), dtype=jnp.float32)

    # PyTorch Linear layout: [out, in].
    w1 = jax.random.normal(kw1, (C_MID, C_IN), jnp.float32) * (1.0 / C_IN ** 0.5)
    w2 = jax.random.normal(kw2, (C_OUT, C_MID), jnp.float32) * (1.0 / C_MID ** 0.5)
    # Norm params perturbed away from identity so they are actually exercised.
    g1 = 1.0 + 0.1 * jax.random.normal(kg1, (C_MID,), jnp.float32)
    b1 = 0.1 * jax.random.normal(kb1, (C_MID,), jnp.float32)
    g2 = 1.0 + 0.1 * jax.random.normal(kg2, (C_OUT,), jnp.float32)
    b2 = 0.1 * jax.random.normal(kb2, (C_OUT,), jnp.float32)

    out = mlp_leaky(x, w1, g1, b1, w2, g2, b2, tile_n=256)
    out = jax.block_until_ready(out)

    ref = _reference(x, w1, g1, b1, w2, g2, b2)
    assert out.shape == (N, C_OUT)
    assert jnp.allclose(out, ref, atol=1e-4, rtol=1e-4), "mismatch vs reference"

    print("KERNEL_OK")
</pallas_src>

<mosaic_0001>
module attributes {stable_mosaic.version = 11 : i64} {
  func.func @_mlp_kernel(%arg0: i32, %arg1: memref<8x128xf32, #tpu.memory_space<vmem>>, %arg2: memref<128x128xf32, #tpu.memory_space<vmem>>, %arg3: memref<1x128xf32, #tpu.memory_space<vmem>>, %arg4: memref<1x128xf32, #tpu.memory_space<vmem>>, %arg5: memref<128x128xf32, #tpu.memory_space<vmem>>, %arg6: memref<1x128xf32, #tpu.memory_space<vmem>>, %arg7: memref<1x128xf32, #tpu.memory_space<vmem>>, %arg8: memref<8x128xf32, #tpu.memory_space<vmem>>) attributes {dimension_semantics = [#tpu.dimension_semantics<parallel>], iteration_bounds = array<i64: 2>, scalar_prefetch = 0 : i64, scratch_operands = 0 : i64, tpu.core_type = #tpu.core_type<tc>, window_params = [{transform_indices = @transform_0, window_bounds = array<i64: 8, 128>}, {pipeline_mode = #tpu.pipeline_mode<synchronous>, transform_indices = @transform_1, window_bounds = array<i64: 128, 128>}, {pipeline_mode = #tpu.pipeline_mode<synchronous>, transform_indices = @transform_2, window_bounds = array<i64: 1, 128>}, {pipeline_mode = #tpu.pipeline_mode<synchronous>, transform_indices = @transform_3, window_bounds = array<i64: 1, 128>}, {pipeline_mode = #tpu.pipeline_mode<synchronous>, transform_indices = @transform_4, window_bounds = array<i64: 128, 128>}, {pipeline_mode = #tpu.pipeline_mode<synchronous>, transform_indices = @transform_5, window_bounds = array<i64: 1, 128>}, {pipeline_mode = #tpu.pipeline_mode<synchronous>, transform_indices = @transform_6, window_bounds = array<i64: 1, 128>}, {transform_indices = @transform_7, window_bounds = array<i64: 8, 128>}]} {
    %c0 = arith.constant 0 : index
    %c0_0 = arith.constant 0 : index
    %0 = vector.load %arg1[%c0, %c0_0] : memref<8x128xf32, #tpu.memory_space<vmem>>, vector<8x128xf32>
    %c0_1 = arith.constant 0 : index
    %c0_2 = arith.constant 0 : index
    %1 = vector.load %arg2[%c0_1, %c0_2] : memref<128x128xf32, #tpu.memory_space<vmem>>, vector<128x128xf32>
    %cst = arith.constant dense<0.000000e+00> : vector<8x128xf32>
    %2 = tpu.matmul %0, %1, %cst {dimension_numbers = #tpu.dot_dimension_numbers<[1], [0], [0], [1], [0, 0, 1, 1], [], []>} : vector<8x128xf32>, vector<128x128xf32>, vector<8x128xf32> -> vector<8x128xf32>
    %c0_3 = arith.constant 0 : index
    %c0_4 = arith.constant 0 : index
    %3 = vector.load %arg3[%c0_3, %c0_4] : memref<1x128xf32, #tpu.memory_space<vmem>>, vector<1x128xf32>
    %c0_5 = arith.constant 0 : index
    %c0_6 = arith.constant 0 : index
    %4 = vector.load %arg4[%c0_5, %c0_6] : memref<1x128xf32, #tpu.memory_space<vmem>>, vector<1x128xf32>
    %5 = tpu.iota {dimensions = array<i32: 1>} : vector<1x128xi32>
    %c48_i32 = arith.constant 48 : i32
    %6 = vector.broadcast %c48_i32 : i32 to vector<1x128xi32>
    %7 = arith.cmpi slt, %5, %6 : vector<1x128xi32>
    %8 = arith.extui %7 : vector<1x128xi1> to vector<1x128xi32>
    %9 = arith.sitofp %8 : vector<1x128xi32> to vector<1x128xf32>
    %cst_7 = arith.constant dense<0.000000e+00> : vector<8xf32>
    %10 = vector.multi_reduction <add>, %2, %cst_7 [1] : vector<8x128xf32> to vector<8xf32>
    %11 = vector.shape_cast %10 : vector<8xf32> to vector<8x1xf32>
    %cst_8 = arith.constant 0.020833334 : f32
    %12 = vector.broadcast %cst_8 : f32 to vector<8x1xf32>
    %13 = arith.mulf %11, %12 : vector<8x1xf32>
    %14 = vector.broadcast %13 : vector<8x1xf32> to vector<8x128xf32>
    %15 = arith.subf %2, %14 : vector<8x128xf32>
    %16 = vector.broadcast %9 : vector<1x128xf32> to vector<8x128xf32>
    %17 = arith.mulf %15, %16 : vector<8x128xf32>
    %18 = arith.mulf %17, %17 : vector<8x128xf32>
    %cst_9 = arith.constant dense<0.000000e+00> : vector<8xf32>
    %19 = vector.multi_reduction <add>, %18, %cst_9 [1] : vector<8x128xf32> to vector<8xf32>
    %20 = vector.shape_cast %19 : vector<8xf32> to vector<8x1xf32>
    %cst_10 = arith.constant 0.020833334 : f32
    %21 = vector.broadcast %cst_10 : f32 to vector<8x1xf32>
    %22 = arith.mulf %20, %21 : vector<8x1xf32>
    %23 = vector.broadcast %13 : vector<8x1xf32> to vector<8x128xf32>
    %24 = arith.subf %2, %23 : vector<8x128xf32>
    %cst_11 = arith.constant 9.99999974E-6 : f32
    %25 = vector.broadcast %cst_11 : f32 to vector<8x1xf32>
    %26 = arith.addf %22, %25 : vector<8x1xf32>
    %27 = math.rsqrt %26 : vector<8x1xf32>
    %28 = vector.broadcast %27 : vector<8x1xf32> to vector<8x128xf32>
    %29 = arith.mulf %24, %28 : vector<8x128xf32>
    %30 = vector.broadcast %3 : vector<1x128xf32> to vector<8x128xf32>
    %31 = arith.mulf %29, %30 : vector<8x128xf32>
    %32 = vector.broadcast %4 : vector<1x128xf32> to vector<8x128xf32>
    %33 = arith.addf %31, %32 : vector<8x128xf32>
    %cst_12 = arith.constant 0.000000e+00 : f32
    %34 = vector.broadcast %cst_12 : f32 to vector<8x128xf32>
    %35 = arith.cmpf oge, %33, %34 : vector<8x128xf32>
    %cst_13 = arith.constant 3.000000e-01 : f32
    %36 = vector.broadcast %cst_13 : f32 to vector<8x128xf32>
    %37 = arith.mulf %36, %33 : vector<8x128xf32>
    %38 = arith.select %35, %33, %37 : vector<8x128xi1>, vector<8x128xf32>
    %c0_14 = arith.constant 0 : index
    %c0_15 = arith.constant 0 : index
    %39 = vector.load %arg5[%c0_14, %c0_15] : memref<128x128xf32, #tpu.memory_space<vmem>>, vector<128x128xf32>
    %cst_16 = arith.constant dense<0.000000e+00> : vector<8x128xf32>
    %40 = tpu.matmul %38, %39, %cst_16 {dimension_numbers = #tpu.dot_dimension_numbers<[1], [0], [0], [1], [0, 0, 1, 1], [], []>} : vector<8x128xf32>, vector<128x128xf32>, vector<8x128xf32> -> vector<8x128xf32>
    %c0_17 = arith.constant 0 : index
    %c0_18 = arith.constant 0 : index
    %41 = vector.load %arg6[%c0_17, %c0_18] : memref<1x128xf32, #tpu.memory_space<vmem>>, vector<1x128xf32>
    %c0_19 = arith.constant 0 : index
    %c0_20 = arith.constant 0 : index
    %42 = vector.load %arg7[%c0_19, %c0_20] : memref<1x128xf32, #tpu.memory_space<vmem>>, vector<1x128xf32>
    %43 = tpu.iota {dimensions = array<i32: 1>} : vector<1x128xi32>
    %c24_i32 = arith.constant 24 : i32
    %44 = vector.broadcast %c24_i32 : i32 to vector<1x128xi32>
    %45 = arith.cmpi slt, %43, %44 : vector<1x128xi32>
    %46 = arith.extui %45 : vector<1x128xi1> to vector<1x128xi32>
    %47 = arith.sitofp %46 : vector<1x128xi32> to vector<1x128xf32>
    %cst_21 = arith.constant dense<0.000000e+00> : vector<8xf32>
    %48 = vector.multi_reduction <add>, %40, %cst_21 [1] : vector<8x128xf32> to vector<8xf32>
    %49 = vector.shape_cast %48 : vector<8xf32> to vector<8x1xf32>
    %cst_22 = arith.constant 0.0416666679 : f32
    %50 = vector.broadcast %cst_22 : f32 to vector<8x1xf32>
    %51 = arith.mulf %49, %50 : vector<8x1xf32>
    %52 = vector.broadcast %51 : vector<8x1xf32> to vector<8x128xf32>
    %53 = arith.subf %40, %52 : vector<8x128xf32>
    %54 = vector.broadcast %47 : vector<1x128xf32> to vector<8x128xf32>
    %55 = arith.mulf %53, %54 : vector<8x128xf32>
    %56 = arith.mulf %55, %55 : vector<8x128xf32>
    %cst_23 = arith.constant dense<0.000000e+00> : vector<8xf32>
    %57 = vector.multi_reduction <add>, %56, %cst_23 [1] : vector<8x128xf32> to vector<8xf32>
    %58 = vector.shape_cast %57 : vector<8xf32> to vector<8x1xf32>
    %cst_24 = arith.constant 0.0416666679 : f32
    %59 = vector.broadcast %cst_24 : f32 to vector<8x1xf32>
    %60 = arith.mulf %58, %59 : vector<8x1xf32>
    %61 = vector.broadcast %51 : vector<8x1xf32> to vector<8x128xf32>
    %62 = arith.subf %40, %61 : vector<8x128xf32>
    %cst_25 = arith.constant 9.99999974E-6 : f32
    %63 = vector.broadcast %cst_25 : f32 to vector<8x1xf32>
    %64 = arith.addf %60, %63 : vector<8x1xf32>
    %65 = math.rsqrt %64 : vector<8x1xf32>
    %66 = vector.broadcast %65 : vector<8x1xf32> to vector<8x128xf32>
    %67 = arith.mulf %62, %66 : vector<8x128xf32>
    %68 = vector.broadcast %41 : vector<1x128xf32> to vector<8x128xf32>
    %69 = arith.mulf %67, %68 : vector<8x128xf32>
    %70 = vector.broadcast %42 : vector<1x128xf32> to vector<8x128xf32>
    %71 = arith.addf %69, %70 : vector<8x128xf32>
    %cst_26 = arith.constant 0.000000e+00 : f32
    %72 = vector.broadcast %cst_26 : f32 to vector<8x128xf32>
    %73 = arith.cmpf oge, %71, %72 : vector<8x128xf32>
    %cst_27 = arith.constant 3.000000e-01 : f32
    %74 = vector.broadcast %cst_27 : f32 to vector<8x128xf32>
    %75 = arith.mulf %74, %71 : vector<8x128xf32>
    %76 = arith.select %73, %71, %75 : vector<8x128xi1>, vector<8x128xf32>
    %c0_28 = arith.constant 0 : index
    %c0_29 = arith.constant 0 : index
    %77 = vector.load %arg8[%c0_28, %c0_29] : memref<8x128xf32, #tpu.memory_space<vmem>>, vector<8x128xf32>
    tpu.vector_store %arg8[%c0_28, %c0_29], %76 {strides = array<i32>} : memref<8x128xf32, #tpu.memory_space<vmem>>, vector<8x128xf32>,
    return
  }
  func.func @transform_0(%arg0: i32) -> (i32, i32) {
    %c0_i32 = arith.constant 0 : i32
    %c0_i32_0 = arith.constant 0 : i32
    return %arg0, %c0_i32 : i32, i32
  }
  func.func @transform_1(%arg0: i32) -> (i32, i32) {
    %c0_i32 = arith.constant 0 : i32
    %c0_i32_0 = arith.constant 0 : i32
    %c0_i32_1 = arith.constant 0 : i32
    return %c0_i32, %c0_i32_0 : i32, i32
  }
  func.func @transform_2(%arg0: i32) -> (i32, i32) {
    %c0_i32 = arith.constant 0 : i32
    %c0_i32_0 = arith.constant 0 : i32
    %c0_i32_1 = arith.constant 0 : i32
    return %c0_i32, %c0_i32_0 : i32, i32
  }
  func.func @transform_3(%arg0: i32) -> (i32, i32) {
    %c0_i32 = arith.constant 0 : i32
    %c0_i32_0 = arith.constant 0 : i32
    %c0_i32_1 = arith.constant 0 : i32
    return %c0_i32, %c0_i32_0 : i32, i32
  }
  func.func @transform_4(%arg0: i32) -> (i32, i32) {
    %c0_i32 = arith.constant 0 : i32
    %c0_i32_0 = arith.constant 0 : i32
    %c0_i32_1 = arith.constant 0 : i32
    return %c0_i32, %c0_i32_0 : i32, i32
  }
  func.func @transform_5(%arg0: i32) -> (i32, i32) {
    %c0_i32 = arith.constant 0 : i32
    %c0_i32_0 = arith.constant 0 : i32
    %c0_i32_1 = arith.constant 0 : i32
    return %c0_i32, %c0_i32_0 : i32, i32
  }
  func.func @transform_6(%arg0: i32) -> (i32, i32) {
    %c0_i32 = arith.constant 0 : i32
    %c0_i32_0 = arith.constant 0 : i32
    %c0_i32_1 = arith.constant 0 : i32
    return %c0_i32, %c0_i32_0 : i32, i32
  }
  func.func @transform_7(%arg0: i32) -> (i32, i32) {
    %c0_i32 = arith.constant 0 : i32
    %c0_i32_0 = arith.constant 0 : i32
    return %arg0, %c0_i32 : i32, i32
  }
}

module attributes {stable_mosaic.version = 11 : i64} {
  func.func @_mlp_kernel(%arg0: i32, %arg1: memref<8x128xf32, #tpu.memory_space<vmem>>, %arg2: memref<128x128xf32, #tpu.memory_space<vmem>>, %arg3: memref<1x128xf32, #tpu.memory_space<vmem>>, %arg4: memref<1x128xf32, #tpu.memory_space<vmem>>, %arg5: memref<128x128xf32, #tpu.memory_space<vmem>>, %arg6: memref<1x128xf32, #tpu.memory_space<vmem>>, %arg7: memref<1x128xf32, #tpu.memory_space<vmem>>, %arg8: memref<8x128xf32, #tpu.memory_space<vmem>>) attributes {dimension_semantics = [#tpu.dimension_semantics<parallel>], iteration_bounds = array<i64: 2>, scalar_prefetch = 0 : i64, scratch_operands = 0 : i64, tpu.core_type = #tpu.core_type<tc>, window_params = [{transform_indices = @transform_0, window_bounds = array<i64: 8, 128>}, {pipeline_mode = #tpu.pipeline_mode<synchronous>, transform_indices = @transform_1, window_bounds = array<i64: 128, 128>}, {pipeline_mode = #tpu.pipeline_mode<synchronous>, transform_indices = @transform_2, window_bounds = array<i64: 1, 128>}, {pipeline_mode = #tpu.pipeline_mode<synchronous>, transform_indices = @transform_3, window_bounds = array<i64: 1, 128>}, {pipeline_mode = #tpu.pipeline_mode<synchronous>, transform_indices = @transform_4, window_bounds = array<i64: 128, 128>}, {pipeline_mode = #tpu.pipeline_mode<synchronous>, transform_indices = @transform_5, window_bounds = array<i64: 1, 128>}, {pipeline_mode = #tpu.pipeline_mode<synchronous>, transform_indices = @transform_6, window_bounds = array<i64: 1, 128>}, {transform_indices = @transform_7, window_bounds = array<i64: 8, 128>}]} {
    %c0 = arith.constant 0 : index
    %c0_0 = arith.constant 0 : index
    %0 = vector.load %arg1[%c0, %c0_0] : memref<8x128xf32, #tpu.memory_space<vmem>>, vector<8x128xf32>
    %c0_1 = arith.constant 0 : index
    %c0_2 = arith.constant 0 : index
    %1 = vector.load %arg2[%c0_1, %c0_2] : memref<128x128xf32, #tpu.memory_space<vmem>>, vector<128x128xf32>
    %cst = arith.constant dense<0.000000e+00> : vector<8x128xf32>
    %2 = tpu.matmul %0, %1, %cst {dimension_numbers = #tpu.dot_dimension_numbers<[1], [0], [0], [1], [0, 0, 1, 1], [], []>} : vector<8x128xf32>, vector<128x128xf32>, vector<8x128xf32> -> vector<8x128xf32>
    %c0_3 = arith.constant 0 : index
    %c0_4 = arith.constant 0 : index
    %3 = vector.load %arg3[%c0_3, %c0_4] : memref<1x128xf32, #tpu.memory_space<vmem>>, vector<1x128xf32>
    %c0_5 = arith.constant 0 : index
    %c0_6 = arith.constant 0 : index
    %4 = vector.load %arg4[%c0_5, %c0_6] : memref<1x128xf32, #tpu.memory_space<vmem>>, vector<1x128xf32>
    %5 = tpu.iota {dimensions = array<i32: 1>} : vector<1x128xi32>
    %c48_i32 = arith.constant 48 : i32
    %6 = vector.broadcast %c48_i32 : i32 to vector<1x128xi32>
    %7 = arith.cmpi slt, %5, %6 : vector<1x128xi32>
    %8 = arith.extui %7 : vector<1x128xi1> to vector<1x128xi32>
    %9 = arith.sitofp %8 : vector<1x128xi32> to vector<1x128xf32>
    %cst_7 = arith.constant dense<0.000000e+00> : vector<8xf32>
    %10 = vector.multi_reduction <add>, %2, %cst_7 [1] : vector<8x128xf32> to vector<8xf32>
    %11 = vector.shape_cast %10 : vector<8xf32> to vector<8x1xf32>
    %cst_8 = arith.constant 0.020833334 : f32
    %12 = vector.broadcast %cst_8 : f32 to vector<8x1xf32>
    %13 = arith.mulf %11, %12 : vector<8x1xf32>
    %14 = vector.broadcast %13 : vector<8x1xf32> to vector<8x128xf32>
    %15 = arith.subf %2, %14 : vector<8x128xf32>
    %16 = vector.broadcast %9 : vector<1x128xf32> to vector<8x128xf32>
    %17 = arith.mulf %15, %16 : vector<8x128xf32>
    %18 = arith.mulf %17, %17 : vector<8x128xf32>
    %cst_9 = arith.constant dense<0.000000e+00> : vector<8xf32>
    %19 = vector.multi_reduction <add>, %18, %cst_9 [1] : vector<8x128xf32> to vector<8xf32>
    %20 = vector.shape_cast %19 : vector<8xf32> to vector<8x1xf32>
    %cst_10 = arith.constant 0.020833334 : f32
    %21 = vector.broadcast %cst_10 : f32 to vector<8x1xf32>
    %22 = arith.mulf %20, %21 : vector<8x1xf32>
    %23 = vector.broadcast %13 : vector<8x1xf32> to vector<8x128xf32>
    %24 = arith.subf %2, %23 : vector<8x128xf32>
    %cst_11 = arith.constant 9.99999974E-6 : f32
    %25 = vector.broadcast %cst_11 : f32 to vector<8x1xf32>
    %26 = arith.addf %22, %25 : vector<8x1xf32>
    %27 = math.rsqrt %26 : vector<8x1xf32>
    %28 = vector.broadcast %27 : vector<8x1xf32> to vector<8x128xf32>
    %29 = arith.mulf %24, %28 : vector<8x128xf32>
    %30 = vector.broadcast %3 : vector<1x128xf32> to vector<8x128xf32>
    %31 = arith.mulf %29, %30 : vector<8x128xf32>
    %32 = vector.broadcast %4 : vector<1x128xf32> to vector<8x128xf32>
    %33 = arith.addf %31, %32 : vector<8x128xf32>
    %cst_12 = arith.constant 0.000000e+00 : f32
    %34 = vector.broadcast %cst_12 : f32 to vector<8x128xf32>
    %35 = arith.cmpf oge, %33, %34 : vector<8x128xf32>
    %cst_13 = arith.constant 3.000000e-01 : f32
    %36 = vector.broadcast %cst_13 : f32 to vector<8x128xf32>
    %37 = arith.mulf %36, %33 : vector<8x128xf32>
    %38 = arith.select %35, %33, %37 : vector<8x128xi1>, vector<8x128xf32>
    %c0_14 = arith.constant 0 : index
    %c0_15 = arith.constant 0 : index
    %39 = vector.load %arg5[%c0_14, %c0_15] : memref<128x128xf32, #tpu.memory_space<vmem>>, vector<128x128xf32>
    %cst_16 = arith.constant dense<0.000000e+00> : vector<8x128xf32>
    %40 = tpu.matmul %38, %39, %cst_16 {dimension_numbers = #tpu.dot_dimension_numbers<[1], [0], [0], [1], [0, 0, 1, 1], [], []>} : vector<8x128xf32>, vector<128x128xf32>, vector<8x128xf32> -> vector<8x128xf32>
    %c0_17 = arith.constant 0 : index
    %c0_18 = arith.constant 0 : index
    %41 = vector.load %arg6[%c0_17, %c0_18] : memref<1x128xf32, #tpu.memory_space<vmem>>, vector<1x128xf32>
    %c0_19 = arith.constant 0 : index
    %c0_20 = arith.constant 0 : index
    %42 = vector.load %arg7[%c0_19, %c0_20] : memref<1x128xf32, #tpu.memory_space<vmem>>, vector<1x128xf32>
    %43 = tpu.iota {dimensions = array<i32: 1>} : vector<1x128xi32>
    %c24_i32 = arith.constant 24 : i32
    %44 = vector.broadcast %c24_i32 : i32 to vector<1x128xi32>
    %45 = arith.cmpi slt, %43, %44 : vector<1x128xi32>
    %46 = arith.extui %45 : vector<1x128xi1> to vector<1x128xi32>
    %47 = arith.sitofp %46 : vector<1x128xi32> to vector<1x128xf32>
    %cst_21 = arith.constant dense<0.000000e+00> : vector<8xf32>
    %48 = vector.multi_reduction <add>, %40, %cst_21 [1] : vector<8x128xf32> to vector<8xf32>
    %49 = vector.shape_cast %48 : vector<8xf32> to vector<8x1xf32>
    %cst_22 = arith.constant 0.0416666679 : f32
    %50 = vector.broadcast %cst_22 : f32 to vector<8x1xf32>
    %51 = arith.mulf %49, %50 : vector<8x1xf32>
    %52 = vector.broadcast %51 : vector<8x1xf32> to vector<8x128xf32>
    %53 = arith.subf %40, %52 : vector<8x128xf32>
    %54 = vector.broadcast %47 : vector<1x128xf32> to vector<8x128xf32>
    %55 = arith.mulf %53, %54 : vector<8x128xf32>
    %56 = arith.mulf %55, %55 : vector<8x128xf32>
    %cst_23 = arith.constant dense<0.000000e+00> : vector<8xf32>
    %57 = vector.multi_reduction <add>, %56, %cst_23 [1] : vector<8x128xf32> to vector<8xf32>
    %58 = vector.shape_cast %57 : vector<8xf32> to vector<8x1xf32>
    %cst_24 = arith.constant 0.0416666679 : f32
    %59 = vector.broadcast %cst_24 : f32 to vector<8x1xf32>
    %60 = arith.mulf %58, %59 : vector<8x1xf32>
    %61 = vector.broadcast %51 : vector<8x1xf32> to vector<8x128xf32>
    %62 = arith.subf %40, %61 : vector<8x128xf32>
    %cst_25 = arith.constant 9.99999974E-6 : f32
    %63 = vector.broadcast %cst_25 : f32 to vector<8x1xf32>
    %64 = arith.addf %60, %63 : vector<8x1xf32>
    %65 = math.rsqrt %64 : vector<8x1xf32>
    %66 = vector.broadcast %65 : vector<8x1xf32> to vector<8x128xf32>
    %67 = arith.mulf %62, %66 : vector<8x128xf32>
    %68 = vector.broadcast %41 : vector<1x128xf32> to vector<8x128xf32>
    %69 = arith.mulf %67, %68 : vector<8x128xf32>
    %70 = vector.broadcast %42 : vector<1x128xf32> to vector<8x128xf32>
    %71 = arith.addf %69, %70 : vector<8x128xf32>
    %cst_26 = arith.constant 0.000000e+00 : f32
    %72 = vector.broadcast %cst_26 : f32 to vector<8x128xf32>
    %73 = arith.cmpf oge, %71, %72 : vector<8x128xf32>
    %cst_27 = arith.constant 3.000000e-01 : f32
    %74 = vector.broadcast %cst_27 : f32 to vector<8x128xf32>
    %75 = arith.mulf %74, %71 : vector<8x128xf32>
    %76 = arith.select %73, %71, %75 : vector<8x128xi1>, vector<8x128xf32>
    %c0_28 = arith.constant 0 : index
    %c0_29 = arith.constant 0 : index
    %77 = vector.load %arg8[%c0_28, %c0_29] : memref<8x128xf32, #tpu.memory_space<vmem>>, vector<8x128xf32>
    tpu.vector_store %arg8[%c0_28, %c0_29], %76 {strides = array<i32>} : memref<8x128xf32, #tpu.memory_space<vmem>>, vector<8x128xf32>,
    return
  }
  func.func @transform_0(%arg0: i32) -> (i32, i32) {
    %c0_i32 = arith.constant 0 : i32
    %c0_i32_0 = arith.constant 0 : i32
    return %arg0, %c0_i32 : i32, i32
  }
  func.func @transform_1(%arg0: i32) -> (i32, i32) {
    %c0_i32 = arith.constant 0 : i32
    %c0_i32_0 = arith.constant 0 : i32
    %c0_i32_1 = arith.constant 0 : i32
    return %c0_i32, %c0_i32_0 : i32, i32
  }
  func.func @transform_2(%arg0: i32) -> (i32, i32) {
    %c0_i32 = arith.constant 0 : i32
    %c0_i32_0 = arith.constant 0 : i32
    %c0_i32_1 = arith.constant 0 : i32
    return %c0_i32, %c0_i32_0 : i32, i32
  }
  func.func @transform_3(%arg0: i32) -> (i32, i32) {
    %c0_i32 = arith.constant 0 : i32
    %c0_i32_0 = arith.constant 0 : i32
    %c0_i32_1 = arith.constant 0 : i32
    return %c0_i32, %c0_i32_0 : i32, i32
  }
  func.func @transform_4(%arg0: i32) -> (i32, i32) {
    %c0_i32 = arith.constant 0 : i32
    %c0_i32_0 = arith.constant 0 : i32
    %c0_i32_1 = arith.constant 0 : i32
    return %c0_i32, %c0_i32_0 : i32, i32
  }
  func.func @transform_5(%arg0: i32) -> (i32, i32) {
    %c0_i32 = arith.constant 0 : i32
    %c0_i32_0 = arith.constant 0 : i32
    %c0_i32_1 = arith.constant 0 : i32
    return %c0_i32, %c0_i32_0 : i32, i32
  }
  func.func @transform_6(%arg0: i32) -> (i32, i32) {
    %c0_i32 = arith.constant 0 : i32
    %c0_i32_0 = arith.constant 0 : i32
    %c0_i32_1 = arith.constant 0 : i32
    return %c0_i32, %c0_i32_0 : i32, i32
  }
  func.func @transform_7(%arg0: i32) -> (i32, i32) {
    %c0_i32 = arith.constant 0 : i32
    %c0_i32_0 = arith.constant 0 : i32
    return %arg0, %c0_i32 : i32, i32
  }
}

</mosaic_0001>

<bundles_post_ra>
// kernel: tpu_custom_call.1
= control target key start
LH: loop header
LB: loop body
LE: loop exit
PB: predicated region body
PF: predicated region fallthrough
CT: control target
= control target key end

     0   :  { %s1299_s0 = inlined_call_operand.hbm [shape: f32[16,128], index: 0, kind: input, shape index: {}]   ;;  %s1300_s1 = inlined_call_operand.hbm [shape: f32[128,128], index: 1, kind: input, shape index: {}]   ;;  %s1301_s2 = inlined_call_operand.vmem [shape: f32[1,128], index: 2, kind: input, shape index: {}]   ;;  %s1302_s3 = inlined_call_operand.vmem [shape: f32[1,128], index: 3, kind: input, shape index: {}]   ;;  %s1303_s4 = inlined_call_operand.hbm [shape: f32[128,128], index: 4, kind: input, shape index: {}]   ;;  %s1304_s5 = inlined_call_operand.vmem [shape: f32[1,128], index: 5, kind: input, shape index: {}]   ;;  %s1305_s6 = inlined_call_operand.vmem [shape: f32[1,128], index: 6, kind: input, shape index: {}]   ;;  %s1306_s7 = inlined_call_operand.hbm [shape: f32[16,128], index: 7, kind: output, shape index: {}]  }
   0x1   :  { %1311 = sst [smem:[#allocation12_spill]] %s1300_s1 }
   0x2   :  { %1312 = sst [smem:[#allocation13_spill]] %s1303_s4 }
   0x3   :  { %12 = vsyncpa [#allocation3], 0 }
   0x4   :  { %14 = vsyncpa [#allocation3 + $0x1], 0 }
   0x5   :  { %15 = vsyncpa [#allocation6], 0 }
   0x6   :  { %16 = vsyncpa [#allocation4], 0 }
   0x7   :  { %18 = vsyncpa [#allocation4 + $0x1], 0  ;;  %s1069_s24 = smov 0   ;;  %s1071_s25 = smov 0  }
   0x8   :  { %s1073_s26 = smov 0   ;;  %s1075_s27 = smov 0  }
   0x9 LB: > { %s1090_s28 = sadd.s32 4294967295, %s1019_s27   ;;  %s670_s29 = sadd.s32 4294967294, %s1019_s27   ;;  %s1019_s27 = sphi %s1075_s27, %s1332_s27   ;;  %s1015_s26 = sphi %s1073_s26, %s1331_s26   ;;  %s1011_s25 = sphi %s1071_s25, %s1330_s25   ;;  %s1007_s24 = sphi %s1069_s24, %s1329_s24  }
   0xa   : > { %p44_p0 = scmp.ne.s32.totalorder %s1011_s25, %s1007_s24  ;;  %p1307_p1 = scmp.eq.s32.totalorder %s1090_s28, 0 }
   0xb   : > { %p200_p3 = scmp.eq.s32.totalorder %s670_s29, 1  ;;  %p671_p5 = scmp.ge.s32.totalorder %s1019_s27, 1 }
   0xc   : > { %p1099_p4 = por %p1307_p1, %p44_p0  ;;  %p207_p7 = scmp.lt.s32.totalorder %s1019_s27, 3 }
   0xd   : > { %p1104_p6 = por %p200_p3, %p44_p0  ;;  %s1021_s10 = smov [#allocation5]  }
   0xe   : > { %s1313_s30 = scalar_select %p1099_p4, 1, 0 }
   0xf   : > { %s1314_s8 = scalar_select %p1104_p6, 1, 0 }
  0x10   : > { %p1109_p8 = pnand %p671_p5, %p207_p7  ;;  %s219_s11 = sshll.u32 %s1021_s10, 4  ;;  %s220_s11 = int_to_ptr.vmem [resolvable:$true] %s219_s11 }
  0x11   : > { %s1022_s13 = smov [#allocation7]   ;;  %s882_s15 = scalar_lea.vmem %s220_s11, 2048 }
  0x12   : > { %s1315_s9 = scalar_select %p1109_p8, 1, 0 }
  0x13   : > { %p808_p9 = pneg %p1109_p8  ;;  %s238_s14 = sshll.u32 %s1022_s13, 4  ;;  %s239_s14 = int_to_ptr.vmem [resolvable:$true] %s238_s14 }
  0x14   : > { %p883_p13 = scmp.ne.s32.totalorder %s220_s11, %s882_s15  ;;  %p890_p5 = scmp.lt.s32.totalorder %s220_s11, %s220_s11 }
  0x15   : > { %p1118_p11 = pnand %p808_p9, %p1307_p1  ;;  %p891_p7 = scmp.lt.s32.totalorder %s882_s15, %s882_s15 }
  0x17   : > { %p873_p12 = pneg %p1118_p11  ;;  %p892_p10 = por %p891_p7, %p890_p5 }
  0x19   : > { %p885_p0 = pnand %p883_p13, %p873_p12 }
  0x1b   : > { %p886_p3 = pneg %p885_p0 }
  0x1d   : > { %p893_p9 = pnand %p892_p10, %p886_p3 }
  0x1f   : > { %896 = shalt.err (!%p893_p9)
}
  0x20   : > { %s1023_s16 = smov 128   ;;  %s1024_s17 = smov 8  }
  0x21   : > { %s1317_s1 = sld [smem:[#allocation12_spill]]  ;;  %s908_s20 = scalar_lea.vmem %s239_s14, 2048 }
  0x22   : > { %p909_p1 = scmp.ne.s32.totalorder %s239_s14, %s908_s20  ;;  %p916_p2 = scmp.lt.s32.totalorder %s239_s14, %s239_s14 }
  0x23   : > { %p917_p6 = scmp.lt.s32.totalorder %s908_s20, %s908_s20 }
  0x24   : > { %p911_p13 = pnand %p909_p1, %p873_p12 }
  0x25   : > { %p918_p5 = por %p917_p6, %p916_p2 }
  0x26   : > { %p912_p0 = pneg %p911_p13 }
  0x27   : > { %811 = dma.hbm_to_vmem [thread:$0]  (!%p1118_p11), %s1317_s1, 2048, %s220_s11, [#allocation6], %s1023_s16, %s1023_s16, %s1024_s17  }
  0x28   : > { %p919_p10 = pnand %p918_p5, %p912_p0 }
  0x2a   : > { %922 = shalt.err (!%p919_p10)
}
  0x2b   : > { %s1318_s4 = sld [smem:[#allocation13_spill]]  ;;  %s1141_s23 = sadd.s32 1, %s1019_s27  }
  0x2c   : > { %s31_s29 = sadd.s32 1, %s1015_s26  ;;  %s28_s10 = ssub.s32 %s1019_s27, %s1141_s23 }
  0x2d   : > { %p38_p1 = scmp.ne.s32.totalorder %s1015_s26, %s1011_s25  ;;  %p29_p2 = scmp.eq.s32.totalorder %s28_s10, 0 }
  0x2e   : > { %p39_p6 = scmp.eq.s32.totalorder %s1019_s27, 0  ;;  %p1319_p12 = scmp.eq.s32.totalorder %s1090_s28, 1 }
  0x2f   : > { %p825_p7 = scmp.lt.s32.totalorder %s1019_s27, 2  ;;  %s258_s13 = sand.u32 1, %s1015_s26  }
  0x30   : > { %p1151_p3 = por %p1319_p12, %p38_p1  ;;  %p40_p9 = por %p39_p6, %p38_p1 }
  0x31   : > { %814 = dma.hbm_to_vmem [thread:$0]  (!%p1118_p11), %s1318_s4, 2048, %s239_s14, [#allocation6], %s1023_s16, %s1023_s16, %s1024_s17  }
  0x32   : > { %s1320_s11 = scalar_select %p1151_p3, 1, 0 }
  0x33   : > { %s1157_s12 = scalar_select %p29_p2, %s1015_s26, %s31_s29  }
  0x34   : > { %s675_s15 = sshll.u32 %s258_s13, 3  ;;  %s676_s14 = sshll.u32 %s1019_s27, 7 }
  0x35   : > { %s1164_s18 = scalar_lea.hbm %s1299_s0, %s676_s14  ;;  %s262_s19 = scalar_lea.vmem [#allocation2], %s675_s15 }
  0x36   : > { %s269_s20 = sshll.u32 %s262_s19, 4  ;;  %p1166_p11 = pnand %p825_p7, %p40_p9  ;;  %s270_s20 = int_to_ptr.vmem [resolvable:$true] %s269_s20 }
  0x37   : > { %s259_s22 = scalar_lea.sflag [#allocation3], %s258_s13  ;;  %s923_s29 = scalar_lea.hbm %s1164_s18, 128 }
  0x38   : > { %p924_p13 = scmp.ne.s32.totalorder %s1164_s18, %s923_s29  ;;  %p925_p0 = pneg %p1166_p11 }
  0x39   : > { %s928_s16 = scalar_lea.hbm %s1299_s0, 256  ;;  %p929_p1 = scmp.lt.s32.totalorder %s1164_s18, %s1299_s0 }
  0x3a   : > { %p926_p5 = pnand %p925_p0, %p924_p13  ;;  %p930_p2 = scmp.lt.s32.totalorder %s928_s16, %s923_s29 }
  0x3c   : > { %p927_p10 = pneg %p926_p5  ;;  %p931_p6 = por %p930_p2, %p929_p1 }
  0x3e   : > { %p932_p12 = pnand %p931_p6, %p927_p10 }
  0x40   : > { %935 = shalt.err (!%p932_p12)
}
  0x41   : > { %s936_s19 = scalar_lea.vmem %s270_s20, 128  ;;  %s1025_s13 = smov [#allocation2]  }
  0x42   : > { %p937_p7 = scmp.ne.s32.totalorder %s270_s20, %s936_s19  ;;  %s941_s1 = sshll.u32 %s1025_s13, 4  ;;  %s942_s1 = int_to_ptr.vmem [resolvable:$false] %s941_s1 }
  0x43   : > { %s943_s4 = scalar_lea.vmem %s942_s1, 256  ;;  %p944_p13 = scmp.lt.s32.totalorder %s270_s20, %s942_s1 }
  0x44   : > { %p939_p9 = pnand %p937_p7, %p925_p0  ;;  %p945_p5 = scmp.lt.s32.totalorder %s943_s4, %s936_s19 }
  0x46   : > { %p940_p3 = pneg %p939_p9  ;;  %p946_p4 = por %p945_p5, %p944_p13 }
  0x48   : > { %p947_p8 = pnand %p946_p4, %p940_p3 }
  0x4a   : > { %950 = shalt.err (!%p947_p8)
}
  0x4b   : > { %818 = dma.hbm_to_vmem [thread:$0]  (!%p1166_p11), %s1164_s18, 128, %s270_s20, %s259_s22  }
  0x4c   : > { %p1322_p10 = scmp.ne.s32.totalorder %s1315_s9, 0 }
  0x4d   : > { %s1187_s29 = sand.u32 (!%p1322_p10), 1, %s1011_s25   ;;  %p1323_p4 = scmp.ne.s32.totalorder (!%p1322_p10), %s1313_s30, 0 }
  0x4e   : > { %278 = sbr.rel (%p1322_p10) target bundleno = 1142 (0x476), region = 48  ;;  %s678_s10 = sshll.u32 (!%p1322_p10), %s1187_s29, 3 }
  0x4f   : > { %s281_s1 = scalar_lea.sflag (!%p1322_p10), [#allocation3], %s1187_s29  ;;  %s1193_s4 = scalar_lea.vmem (!%p1322_p10), [#allocation2], %s678_s10 }
  0x53   : > { %994 = dma.done.wait (%p1323_p4), %s281_s1, 128  }
  0x54   : > { %996 = vsyncadd (%p1323_p4), %s281_s1, 4294967168  ;;  %p1324_p8 = scmp.eq.s32.totalorder %s1090_s28, 0 }
  0x56   : > { %998 = dma.done.wait (%p1324_p8), [#allocation6], 4096   ;;  %p1325_p3 = pmov %p1324_p8 }
  0x57   : > { %v1026_v0 = vmov 0.0   ;;  %vm1027_vm0 = vmmov 0   ;;  %v339_v1 = vld [vmem:[#allocation5 + $0x78] sm:$0xff]  ;;  %v338_v2 = vld [vmem:[#allocation5 + $0x70] sm:$0xff]  ;;  %v337_v3 = vld [vmem:[#allocation5 + $0x68] sm:$0xff]  ;;  %v412_v22 = vlaneseq  ;;  %s689_s17 = sshll.u32 %s1090_s28, 7 }
  0x58   : > { %1000 = vsyncadd (%p1325_p3), [#allocation6], 4294963200  ;;  %726 = vmatprep.subr.mxu0 %v1026_v0  ;;  %758 = vmatprep.mubr.msk.f32.mxu0 %vm1027_vm0, %v1026_v0  ;;  %v336_v4 = vld [vmem:[#allocation5 + $0x60] sm:$0xff]  ;;  %v335_v5 = vld [vmem:[#allocation5 + $0x58] sm:$0xff]  ;;  %s322_s15 = scalar_lea.vmem [#allocation8], %s678_s10  ;;  %s568_s30 = scalar_lea.sflag [#allocation4], %s1187_s29 }
  0x59   : > { %761 = vmatprep.subr.mxu1 %v1026_v0  ;;  %793 = vmatprep.mubr.msk.f32.mxu1 %vm1027_vm0, %v1026_v0  ;;  %v334_v6 = vld [vmem:[#allocation5 + $0x50] sm:$0xff]  ;;  %v333_v7 = vld [vmem:[#allocation5 + $0x48] sm:$0xff]  ;;  %v332_v8 = vld [vmem:[#allocation5 + $0x40] sm:$0xff]  ;;  %v1225_v23 = vand.u32 127, %v412_v22  ;;  %s581_s19 = sshll.u32 %s322_s15, 4  ;;  %p1326_p0 = scmp.ne.s32.totalorder %s1320_s11, 0  ;;  %s582_s19 = int_to_ptr.vmem [resolvable:$true] %s581_s19 }
  0x5a   : > { %727 = vmatpush3.msra.mxu0 %v339_v1  ;;  %v331_v9 = vld [vmem:[#allocation5 + $0x38] sm:$0xff]  ;;  %v330_v10 = vld [vmem:[#allocation5 + $0x30] sm:$0xff]  ;;  %v329_v11 = vld [vmem:[#allocation5 + $0x28] sm:$0xff]  ;;  %s951_s9 = scalar_lea.vmem %s582_s19, 128  ;;  %s1028_s28 = smov [#allocation8]  }
  0x5b   : > { %728 = vmatprep.subr.mxu0 %v1026_v0  ;;  %v328_v12 = vld [vmem:[#allocation5 + $0x20] sm:$0xff]  ;;  %v327_v13 = vld [vmem:[#allocation5 + $0x18] sm:$0xff]  ;;  %v326_v14 = vld [vmem:[#allocation5 + $0x10] sm:$0xff]  ;;  %vm414_vm1 = vcmp.lt.s32.totalorder %v1225_v23, 48  ;;  %vm534_vm3 = vcmp.lt.s32.totalorder %v1225_v23, 24  ;;  %p952_p11 = scmp.ne.s32.totalorder %s582_s19, %s951_s9  ;;  %s955_s18 = sshll.u32 %s1028_s28, 4  ;;  %s956_s18 = int_to_ptr.vmem [resolvable:$false] %s955_s18 }
  0x5c   : > { %729 = vmatpush3.msra.mxu0 %v338_v2  ;;  %v325_v15 = vld [vmem:[#allocation5 + $0x8] sm:$0xff]  ;;  %v324_v16 = vld [vmem:[#allocation5] sm:$0xff]  ;;  %v323_v17 = vld [vmem:[%s1193_s4] sm:$0xff]  ;;  %v682_v26 = vsel %vm414_vm1, 1.0, %v1026_v0  ;;  %v685_v59 = vsel %vm534_vm3, 1.0, %v1026_v0  ;;  %s1262_s4 = scalar_lea.hbm %s1306_s7, %s689_s17  ;;  %s957_s10 = scalar_lea.vmem %s956_s18, 256 }
  0x5d   : > { %730 = vmatprep.subr.mxu0 %v1026_v0  ;;  %v461_v20 = vld [vmem:[#allocation7 + $0x78] sm:$0xff]  ;;  %v460_v21 = vld [vmem:[#allocation7 + $0x70] sm:$0xff]  ;;  %v459_v30 = vld [vmem:[#allocation7 + $0x68] sm:$0xff]  ;;  %p953_p1 = pnand %p952_p11, %p1326_p0  ;;  %p958_p6 = scmp.lt.s32.totalorder %s582_s19, %s956_s18 }
  0x5e   : > { %731 = vmatpush3.msra.mxu0 %v337_v3  ;;  %762 = vmatpush3.msra.mxu1 %v461_v20  ;;  %v458_v31 = vld [vmem:[#allocation7 + $0x60] sm:$0xff]  ;;  %v457_v32 = vld [vmem:[#allocation7 + $0x58] sm:$0xff]  ;;  %v456_v33 = vld [vmem:[#allocation7 + $0x50] sm:$0xff]  ;;  %p959_p12 = scmp.lt.s32.totalorder %s957_s10, %s951_s9 }
  0x5f   : > { %732 = vmatprep.subr.mxu0 %v1026_v0  ;;  %763 = vmatprep.subr.mxu1 %v1026_v0  ;;  %v455_v34 = vld [vmem:[#allocation7 + $0x48] sm:$0xff]  ;;  %v454_v35 = vld [vmem:[#allocation7 + $0x40] sm:$0xff]  ;;  %v453_v36 = vld [vmem:[#allocation7 + $0x38] sm:$0xff]  ;;  %p954_p2 = pneg %p953_p1 }
  0x60   : > { %733 = vmatpush3.msra.mxu0 %v336_v4  ;;  %764 = vmatpush3.msra.mxu1 %v460_v21  ;;  %v452_v37 = vld [vmem:[#allocation7 + $0x30] sm:$0xff]  ;;  %v451_v38 = vld [vmem:[#allocation7 + $0x28] sm:$0xff]  ;;  %v450_v39 = vld [vmem:[#allocation7 + $0x20] sm:$0xff]  ;;  %p960_p7 = por %p959_p12, %p958_p6 }
  0x61   : > { %734 = vmatprep.subr.mxu0 %v1026_v0  ;;  %765 = vmatprep.subr.mxu1 %v1026_v0  ;;  %v449_v40 = vld [vmem:[#allocation7 + $0x18] sm:$0xff]  ;;  %v448_v41 = vld [vmem:[#allocation7 + $0x10] sm:$0xff]  ;;  %v447_v42 = vld [vmem:[#allocation7 + $0x8] sm:$0xff] }
  0x62   : > { %735 = vmatpush3.msra.mxu0 %v335_v5  ;;  %766 = vmatpush3.msra.mxu1 %v459_v30  ;;  %v446_v43 = vld [vmem:[#allocation7] sm:$0xff]  ;;  %v683_v48 = vld [vmem:[%s1301_s2] ss:$0 sm:$0xff]  ;;  %p961_p9 = pnand %p960_p7, %p954_p2 }
  0x63   : > { %736 = vmatprep.subr.mxu0 %v1026_v0  ;;  %767 = vmatprep.subr.mxu1 %v1026_v0  ;;  %v684_v50 = vld [vmem:[%s1302_s3] ss:$0 sm:$0xff] }
  0x64   : > { %737 = vmatpush3.msra.mxu0 %v334_v6  ;;  %768 = vmatpush3.msra.mxu1 %v458_v31  ;;  %v686_v4 = vld [vmem:[%s1304_s5] ss:$0 sm:$0xff] }
  0x65   : > { %738 = vmatprep.subr.mxu0 %v1026_v0  ;;  %769 = vmatprep.subr.mxu1 %v1026_v0 }
  0x66   : > { %739 = vmatpush3.msra.mxu0 %v333_v7  ;;  %770 = vmatpush3.msra.mxu1 %v457_v32 }
  0x67   : > { %740 = vmatprep.subr.mxu0 %v1026_v0  ;;  %771 = vmatprep.subr.mxu1 %v1026_v0 }
  0x68   : > { %741 = vmatpush3.msra.mxu0 %v332_v8  ;;  %772 = vmatpush3.msra.mxu1 %v456_v33 }
  0x69   : > { %742 = vmatprep.subr.mxu0 %v1026_v0  ;;  %773 = vmatprep.subr.mxu1 %v1026_v0 }
  0x6a   : > { %743 = vmatpush3.msra.mxu0 %v331_v9  ;;  %774 = vmatpush3.msra.mxu1 %v455_v34 }
  0x6b   : > { %744 = vmatprep.subr.mxu0 %v1026_v0  ;;  %775 = vmatprep.subr.mxu1 %v1026_v0 }
  0x6c   : > { %745 = vmatpush3.msra.mxu0 %v330_v10  ;;  %776 = vmatpush3.msra.mxu1 %v454_v35 }
  0x6d   : > { %746 = vmatprep.subr.mxu0 %v1026_v0  ;;  %777 = vmatprep.subr.mxu1 %v1026_v0 }
  0x6e   : > { %747 = vmatpush3.msra.mxu0 %v329_v11  ;;  %778 = vmatpush3.msra.mxu1 %v453_v36 }
  0x6f   : > { %748 = vmatprep.subr.mxu0 %v1026_v0  ;;  %779 = vmatprep.subr.mxu1 %v1026_v0 }
  0x70   : > { %749 = vmatpush3.msra.mxu0 %v328_v12  ;;  %780 = vmatpush3.msra.mxu1 %v452_v37 }
  0x71   : > { %750 = vmatprep.subr.mxu0 %v1026_v0  ;;  %781 = vmatprep.subr.mxu1 %v1026_v0 }
  0x72   : > { %751 = vmatpush3.msra.mxu0 %v327_v13  ;;  %782 = vmatpush3.msra.mxu1 %v451_v38 }
  0x73   : > { %752 = vmatprep.subr.mxu0 %v1026_v0  ;;  %783 = vmatprep.subr.mxu1 %v1026_v0 }
  0x74   : > { %753 = vmatpush3.msra.mxu0 %v326_v14  ;;  %784 = vmatpush3.msra.mxu1 %v450_v39 }
  0x75   : > { %754 = vmatprep.subr.mxu0 %v1026_v0  ;;  %785 = vmatprep.subr.mxu1 %v1026_v0 }
  0x76   : > { %755 = vmatpush3.msra.mxu0 %v325_v15  ;;  %786 = vmatpush3.msra.mxu1 %v449_v40 }
  0x77   : > { %756 = vmatprep.subr.mxu0 %v1026_v0  ;;  %787 = vmatprep.subr.mxu1 %v1026_v0 }
  0x78   : > { %757 = vmatpush3.msra.mxu0 %v324_v16  ;;  %788 = vmatpush3.msra.mxu1 %v448_v41 }
  0x79   : > { %759 = vmatmul.mubr.f32.vlgmr.msra.gmra.mxu0 %v323_v17  ;;  %789 = vmatprep.subr.mxu1 %v1026_v0 }
  0x7a   : > { %790 = vmatpush3.msra.mxu1 %v447_v42 }
  0x7b   : > { %791 = vmatprep.subr.mxu1 %v1026_v0  ;;  %v687_v0 = vld [vmem:[%s1305_s6] ss:$0 sm:$0xff] }
  0x7c   : > { %792 = vmatpush3.msra.mxu1 %v446_v43 }
 0x139   : > { %v406_v18 = vpop.f32.mrf.mxu0 }
 0x13a   : > { %417 = vadd.xlane.f32.xlu0 %v406_v18 }
 0x13b   : > { %v760_v19 = vpop.f32.mrf.mxu0 }
 0x1c3   : > { %v418_v24 = vpop.xlane.xlu0 %417 }
 0x1c4   : > { %v419_v25 = vmul.f32 0.020833334, %v418_v24 }
 0x1c6   : > { %v420_v27 = vsub.f32 %v406_v18, %v419_v25 }
 0x1c8   : > { %v421_v28 = vmul.f32 %v682_v26, %v420_v27 }
 0x1ca   : > { %v422_v29 = vmul.f32 %v421_v28, %v421_v28 }
 0x1cc   : > { %423 = vadd.xlane.f32.xlu0 %v422_v29 }
 0x255   : > { %v424_v44 = vpop.xlane.xlu0 %423 }
 0x256   : > { %v425_v45 = vmul.f32 0.020833334, %v424_v44 }
 0x258   : > { %v426_v46 = vadd.f32 1e-05, %v425_v45 }
 0x25a   : > { %867 = vrsqrt.f32 %v426_v46 }
 0x267   : > { %v868_v47 = vpop.eup %867 }
 0x268   : > { %v428_v49 = vmul.f32 %v868_v47, %v420_v27 }
 0x26a   : > { %v435_v51 = vmul.f32 %v683_v48, %v428_v49 }
 0x26c   : > { %v442_v52 = vadd.f32 %v684_v50, %v435_v51 }
 0x26e   : > { %vm443_vm2 = vcmp.ge.f32.partialorder %v442_v52, 0.0  ;;  %v444_v53 = vmul.f32 0.3, %v442_v52 }
 0x270   : > { %v445_v54 = vsel %vm443_vm2, %v442_v52, %v444_v53 }
 0x271   : > { %794 = vmatmul.mubr.f32.vlgmr.msra.gmra.mxu1 %v445_v54 }
 0x331   : > { %v528_v55 = vpop.f32.mrf.mxu1 }
 0x332   : > { %537 = vadd.xlane.f32.xlu1 %v528_v55 }
 0x333   : > { %v795_v56 = vpop.f32.mrf.mxu1 }
 0x3bb   : > { %v538_v57 = vpop.xlane.xlu1 %537 }
 0x3bc   : > { %v539_v58 = vmul.f32 0.041666668, %v538_v57 }
 0x3be   : > { %v540_v60 = vsub.f32 %v528_v55, %v539_v58 }
 0x3c0   : > { %v541_v61 = vmul.f32 %v685_v59, %v540_v60 }
 0x3c2   : > { %v542_v62 = vmul.f32 %v541_v61, %v541_v61 }
 0x3c4   : > { %543 = vadd.xlane.f32.xlu1 %v542_v62 }
 0x44d   : > { %v544_v63 = vpop.xlane.xlu1 %543 }
 0x44e   : > { %v545_v1 = vmul.f32 0.041666668, %v544_v63 }
 0x450   : > { %v546_v2 = vadd.f32 1e-05, %v545_v1 }
 0x452   : > { %869 = vrsqrt.f32 %v546_v2 }
 0x45f   : > { %v870_v3 = vpop.eup %869 }
 0x460   : > { %v548_v5 = vmul.f32 %v870_v3, %v540_v60 }
 0x462   : > { %v555_v6 = vmul.f32 %v686_v4, %v548_v5 }
 0x464   : > { %v562_v7 = vadd.f32 %v687_v0, %v555_v6 }
 0x466   : > { %vm563_vm4 = vcmp.ge.f32.partialorder %v562_v7, 0.0  ;;  %v564_v8 = vmul.f32 0.3, %v562_v7 }
 0x468   : > { %v565_v9 = vsel %vm563_vm4, %v562_v7, %v564_v8 }
 0x469   : > { %566 = vst [vmem:[%s322_s15] sm:$0xff] %v565_v9 }
 0x46a   : > { %964 = shalt.err (!%p961_p9)
}
 0x46b   : > { %s965_s20 = scalar_lea.hbm %s1262_s4, 128  ;;  %s969_s22 = scalar_lea.hbm %s1306_s7, 256 }
 0x46c   : > { %p966_p13 = scmp.ne.s32.totalorder %s1262_s4, %s965_s20  ;;  %p970_p4 = scmp.lt.s32.totalorder %s1262_s4, %s1306_s7 }
 0x46d   : > { %p971_p8 = scmp.lt.s32.totalorder %s969_s22, %s965_s20 }
 0x46e   : > { %p967_p5 = pnand %p966_p13, %p1326_p0 }
 0x46f   : > { %p972_p3 = por %p971_p8, %p970_p4 }
 0x470   : > { %p968_p10 = pneg %p967_p5 }
 0x472   : > { %p973_p11 = pnand %p972_p3, %p968_p10 }
 0x474   : > { %976 = shalt.err (!%p973_p11)
}
 0x475   : > { %806 = dma.vmem_to_hbm [thread:$0]  (%p1326_p0), %s582_s19, 128, %s1262_s4, %s568_s30  }
 0x476 PF: > { %s593_s17 = sand.u32 1, %s1007_s24   ;;  %p1327_p1 = scmp.ne.s32.totalorder %s1314_s8, 0 }
 0x477   : > { %p1328_p2 = scmp.ge.s32.totalorder %s1019_s27, 2  ;;  %s594_s15 = scalar_lea.sflag [#allocation4], %s593_s17 }
 0x479   : > { %p820_p6 = pnand %p1328_p2, %p1327_p1 }
 0x47b   : > { %p821_p12 = pneg %p820_p6 }
 0x47d   : > { %1002 = dma.done.wait (%p821_p12), %s594_s15, 128  }
 0x47e   : > { %1004 = vsyncadd (%p821_p12), %s594_s15, 4294967168  ;;  %p21_p7 = scmp.ge.s32.totalorder %s1141_s23, 4   ;;  %s1329_s24 = smov %s1011_s25 }
 0x47f   : > { %s1330_s25 = smov %s1015_s26  ;;  %s1331_s26 = smov %s1157_s12 }
 0x480   : > { %s1332_s27 = smov %s1141_s23  ;;  %23 = sbr.rel (!%p21_p7) target bundleno = 9 (0x9), region = 101 }
 0x485   :  { %599 = vsyncpa [#allocation3], 1 }
 0x486   :  { %601 = vsyncpa [#allocation3 + $0x1], 1 }
 0x487   :  { %602 = vsyncpa [#allocation6], 1 }
 0x488   :  { %603 = vsyncpa [#allocation4], 1 }
 0x489   :  { %605 = vsyncpa [#allocation4 + $0x1], 1 }

// kernel: tpu_custom_call.1
= control target key start
LH: loop header
LB: loop body
LE: loop exit
PB: predicated region body
PF: predicated region fallthrough
CT: control target
= control target key end

     0   :  { %s1299_s0 = inlined_call_operand.hbm [shape: f32[16,128], index: 0, kind: input, shape index: {}]   ;;  %s1300_s1 = inlined_call_operand.hbm [shape: f32[128,128], index: 1, kind: input, shape index: {}]   ;;  %s1301_s2 = inlined_call_operand.vmem [shape: f32[1,128], index: 2, kind: input, shape index: {}]   ;;  %s1302_s3 = inlined_call_operand.vmem [shape: f32[1,128], index: 3, kind: input, shape index: {}]   ;;  %s1303_s4 = inlined_call_operand.hbm [shape: f32[128,128], index: 4, kind: input, shape index: {}]   ;;  %s1304_s5 = inlined_call_operand.vmem [shape: f32[1,128], index: 5, kind: input, shape index: {}]   ;;  %s1305_s6 = inlined_call_operand.vmem [shape: f32[1,128], index: 6, kind: input, shape index: {}]   ;;  %s1306_s7 = inlined_call_operand.hbm [shape: f32[16,128], index: 7, kind: output, shape index: {}]  }
   0x1   :  { %1311 = sst [smem:[#allocation12_spill]] %s1300_s1 }
   0x2   :  { %1312 = sst [smem:[#allocation13_spill]] %s1303_s4 }
   0x3   :  { %12 = vsyncpa [#allocation3], 0 }
   0x4   :  { %14 = vsyncpa [#allocation3 + $0x1], 0 }
   0x5   :  { %15 = vsyncpa [#allocation6], 0 }
   0x6   :  { %16 = vsyncpa [#allocation4], 0 }
   0x7   :  { %18 = vsyncpa [#allocation4 + $0x1], 0  ;;  %s1069_s24 = smov 0   ;;  %s1071_s25 = smov 0  }
   0x8   :  { %s1073_s26 = smov 0   ;;  %s1075_s27 = smov 0  }
   0x9 LB: > { %s1090_s28 = sadd.s32 4294967295, %s1019_s27   ;;  %s670_s29 = sadd.s32 4294967294, %s1019_s27   ;;  %s1019_s27 = sphi %s1075_s27, %s1332_s27   ;;  %s1015_s26 = sphi %s1073_s26, %s1331_s26   ;;  %s1011_s25 = sphi %s1071_s25, %s1330_s25   ;;  %s1007_s24 = sphi %s1069_s24, %s1329_s24  }
   0xa   : > { %p44_p0 = scmp.ne.s32.totalorder %s1011_s25, %s1007_s24  ;;  %p1307_p1 = scmp.eq.s32.totalorder %s1090_s28, 0 }
   0xb   : > { %p200_p3 = scmp.eq.s32.totalorder %s670_s29, 1  ;;  %p671_p5 = scmp.ge.s32.totalorder %s1019_s27, 1 }
   0xc   : > { %p1099_p4 = por %p1307_p1, %p44_p0  ;;  %p207_p7 = scmp.lt.s32.totalorder %s1019_s27, 3 }
   0xd   : > { %p1104_p6 = por %p200_p3, %p44_p0  ;;  %s1021_s10 = smov [#allocation5]  }
   0xe   : > { %s1313_s30 = scalar_select %p1099_p4, 1, 0 }
   0xf   : > { %s1314_s8 = scalar_select %p1104_p6, 1, 0 }
  0x10   : > { %p1109_p8 = pnand %p671_p5, %p207_p7  ;;  %s219_s11 = sshll.u32 %s1021_s10, 4  ;;  %s220_s11 = int_to_ptr.vmem [resolvable:$true] %s219_s11 }
  0x11   : > { %s1022_s13 = smov [#allocation7]   ;;  %s882_s15 = scalar_lea.vmem %s220_s11, 2048 }
  0x12   : > { %s1315_s9 = scalar_select %p1109_p8, 1, 0 }
  0x13   : > { %p808_p9 = pneg %p1109_p8  ;;  %s238_s14 = sshll.u32 %s1022_s13, 4  ;;  %s239_s14 = int_to_ptr.vmem [resolvable:$true] %s238_s14 }
  0x14   : > { %p883_p13 = scmp.ne.s32.totalorder %s220_s11, %s882_s15  ;;  %p890_p5 = scmp.lt.s32.totalorder %s220_s11, %s220_s11 }
  0x15   : > { %p1118_p11 = pnand %p808_p9, %p1307_p1  ;;  %p891_p7 = scmp.lt.s32.totalorder %s882_s15, %s882_s15 }
  0x17   : > { %p873_p12 = pneg %p1118_p11  ;;  %p892_p10 = por %p891_p7, %p890_p5 }
  0x19   : > { %p885_p0 = pnand %p883_p13, %p873_p12 }
  0x1b   : > { %p886_p3 = pneg %p885_p0 }
  0x1d   : > { %p893_p9 = pnand %p892_p10, %p886_p3 }
  0x1f   : > { %896 = shalt.err (!%p893_p9)
}
  0x20   : > { %s1023_s16 = smov 128   ;;  %s1024_s17 = smov 8  }
  0x21   : > { %s1317_s1 = sld [smem:[#allocation12_spill]]  ;;  %s908_s20 = scalar_lea.vmem %s239_s14, 2048 }
  0x22   : > { %p909_p1 = scmp.ne.s32.totalorder %s239_s14, %s908_s20  ;;  %p916_p2 = scmp.lt.s32.totalorder %s239_s14, %s239_s14 }
  0x23   : > { %p917_p6 = scmp.lt.s32.totalorder %s908_s20, %s908_s20 }
  0x24   : > { %p911_p13 = pnand %p909_p1, %p873_p12 }
  0x25   : > { %p918_p5 = por %p917_p6, %p916_p2 }
  0x26   : > { %p912_p0 = pneg %p911_p13 }
  0x27   : > { %811 = dma.hbm_to_vmem [thread:$0]  (!%p1118_p11), %s1317_s1, 2048, %s220_s11, [#allocation6], %s1023_s16, %s1023_s16, %s1024_s17  }
  0x28   : > { %p919_p10 = pnand %p918_p5, %p912_p0 }
  0x2a   : > { %922 = shalt.err (!%p919_p10)
}
  0x2b   : > { %s1318_s4 = sld [smem:[#allocation13_spill]]  ;;  %s1141_s23 = sadd.s32 1, %s1019_s27  }
  0x2c   : > { %s31_s29 = sadd.s32 1, %s1015_s26  ;;  %s28_s10 = ssub.s32 %s1019_s27, %s1141_s23 }
  0x2d   : > { %p38_p1 = scmp.ne.s32.totalorder %s1015_s26, %s1011_s25  ;;  %p29_p2 = scmp.eq.s32.totalorder %s28_s10, 0 }
  0x2e   : > { %p39_p6 = scmp.eq.s32.totalorder %s1019_s27, 0  ;;  %p1319_p12 = scmp.eq.s32.totalorder %s1090_s28, 1 }
  0x2f   : > { %p825_p7 = scmp.lt.s32.totalorder %s1019_s27, 2  ;;  %s258_s13 = sand.u32 1, %s1015_s26  }
  0x30   : > { %p1151_p3 = por %p1319_p12, %p38_p1  ;;  %p40_p9 = por %p39_p6, %p38_p1 }
  0x31   : > { %814 = dma.hbm_to_vmem [thread:$0]  (!%p1118_p11), %s1318_s4, 2048, %s239_s14, [#allocation6], %s1023_s16, %s1023_s16, %s1024_s17  }
  0x32   : > { %s1320_s11 = scalar_select %p1151_p3, 1, 0 }
  0x33   : > { %s1157_s12 = scalar_select %p29_p2, %s1015_s26, %s31_s29  }
  0x34   : > { %s675_s15 = sshll.u32 %s258_s13, 3  ;;  %s676_s14 = sshll.u32 %s1019_s27, 7 }
  0x35   : > { %s1164_s18 = scalar_lea.hbm %s1299_s0, %s676_s14  ;;  %s262_s19 = scalar_lea.vmem [#allocation2], %s675_s15 }
  0x36   : > { %s269_s20 = sshll.u32 %s262_s19, 4  ;;  %p1166_p11 = pnand %p825_p7, %p40_p9  ;;  %s270_s20 = int_to_ptr.vmem [resolvable:$true] %s269_s20 }
  0x37   : > { %s259_s22 = scalar_lea.sflag [#allocation3], %s258_s13  ;;  %s923_s29 = scalar_lea.hbm %s1164_s18, 128 }
  0x38   : > { %p924_p13 = scmp.ne.s32.totalorder %s1164_s18, %s923_s29  ;;  %p925_p0 = pneg %p1166_p11 }
  0x39   : > { %s928_s16 = scalar_lea.hbm %s1299_s0, 256  ;;  %p929_p1 = scmp.lt.s32.totalorder %s1164_s18, %s1299_s0 }
  0x3a   : > { %p926_p5 = pnand %p925_p0, %p924_p13  ;;  %p930_p2 = scmp.lt.s32.totalorder %s928_s16, %s923_s29 }
  0x3c   : > { %p927_p10 = pneg %p926_p5  ;;  %p931_p6 = por %p930_p2, %p929_p1 }
  0x3e   : > { %p932_p12 = pnand %p931_p6, %p927_p10 }
  0x40   : > { %935 = shalt.err (!%p932_p12)
}
  0x41   : > { %s936_s19 = scalar_lea.vmem %s270_s20, 128  ;;  %s1025_s13 = smov [#allocation2]  }
  0x42   : > { %p937_p7 = scmp.ne.s32.totalorder %s270_s20, %s936_s19  ;;  %s941_s1 = sshll.u32 %s1025_s13, 4  ;;  %s942_s1 = int_to_ptr.vmem [resolvable:$false] %s941_s1 }
  0x43   : > { %s943_s4 = scalar_lea.vmem %s942_s1, 256  ;;  %p944_p13 = scmp.lt.s32.totalorder %s270_s20, %s942_s1 }
  0x44   : > { %p939_p9 = pnand %p937_p7, %p925_p0  ;;  %p945_p5 = scmp.lt.s32.totalorder %s943_s4, %s936_s19 }
  0x46   : > { %p940_p3 = pneg %p939_p9  ;;  %p946_p4 = por %p945_p5, %p944_p13 }
  0x48   : > { %p947_p8 = pnand %p946_p4, %p940_p3 }
  0x4a   : > { %950 = shalt.err (!%p947_p8)
}
  0x4b   : > { %818 = dma.hbm_to_vmem [thread:$0]  (!%p1166_p11), %s1164_s18, 128, %s270_s20, %s259_s22  }
  0x4c   : > { %p1322_p10 = scmp.ne.s32.totalorder %s1315_s9, 0 }
  0x4d   : > { %s1187_s29 = sand.u32 (!%p1322_p10), 1, %s1011_s25   ;;  %p1323_p4 = scmp.ne.s32.totalorder (!%p1322_p10), %s1313_s30, 0 }
  0x4e   : > { %278 = sbr.rel (%p1322_p10) target bundleno = 1142 (0x476), region = 48  ;;  %s678_s10 = sshll.u32 (!%p1322_p10), %s1187_s29, 3 }
  0x4f   : > { %s281_s1 = scalar_lea.sflag (!%p1322_p10), [#allocation3], %s1187_s29  ;;  %s1193_s4 = scalar_lea.vmem (!%p1322_p10), [#allocation2], %s678_s10 }
  0x53   : > { %994 = dma.done.wait (%p1323_p4), %s281_s1, 128  }
  0x54   : > { %996 = vsyncadd (%p1323_p4), %s281_s1, 4294967168  ;;  %p1324_p8 = scmp.eq.s32.totalorder %s1090_s28, 0 }
  0x56   : > { %998 = dma.done.wait (%p1324_p8), [#allocation6], 4096   ;;  %p1325_p3 = pmov %p1324_p8 }
  0x57   : > { %v1026_v0 = vmov 0.0   ;;  %vm1027_vm0 = vmmov 0   ;;  %v339_v1 = vld [vmem:[#allocation5 + $0x78] sm:$0xff]  ;;  %v338_v2 = vld [vmem:[#allocation5 + $0x70] sm:$0xff]  ;;  %v337_v3 = vld [vmem:[#allocation5 + $0x68] sm:$0xff]  ;;  %v412_v22 = vlaneseq  ;;  %s689_s17 = sshll.u32 %s1090_s28, 7 }
  0x58   : > { %1000 = vsyncadd (%p1325_p3), [#allocation6], 4294963200  ;;  %726 = vmatprep.subr.mxu0 %v1026_v0  ;;  %758 = vmatprep.mubr.msk.f32.mxu0 %vm1027_vm0, %v1026_v0  ;;  %v336_v4 = vld [vmem:[#allocation5 + $0x60] sm:$0xff]  ;;  %v335_v5 = vld [vmem:[#allocation5 + $0x58] sm:$0xff]  ;;  %s322_s15 = scalar_lea.vmem [#allocation8], %s678_s10  ;;  %s568_s30 = scalar_lea.sflag [#allocation4], %s1187_s29 }
  0x59   : > { %761 = vmatprep.subr.mxu1 %v1026_v0  ;;  %793 = vmatprep.mubr.msk.f32.mxu1 %vm1027_vm0, %v1026_v0  ;;  %v334_v6 = vld [vmem:[#allocation5 + $0x50] sm:$0xff]  ;;  %v333_v7 = vld [vmem:[#allocation5 + $0x48] sm:$0xff]  ;;  %v332_v8 = vld [vmem:[#allocation5 + $0x40] sm:$0xff]  ;;  %v1225_v23 = vand.u32 127, %v412_v22  ;;  %s581_s19 = sshll.u32 %s322_s15, 4  ;;  %p1326_p0 = scmp.ne.s32.totalorder %s1320_s11, 0  ;;  %s582_s19 = int_to_ptr.vmem [resolvable:$true] %s581_s19 }
  0x5a   : > { %727 = vmatpush3.msra.mxu0 %v339_v1  ;;  %v331_v9 = vld [vmem:[#allocation5 + $0x38] sm:$0xff]  ;;  %v330_v10 = vld [vmem:[#allocation5 + $0x30] sm:$0xff]  ;;  %v329_v11 = vld [vmem:[#allocation5 + $0x28] sm:$0xff]  ;;  %s951_s9 = scalar_lea.vmem %s582_s19, 128  ;;  %s1028_s28 = smov [#allocation8]  }
  0x5b   : > { %728 = vmatprep.subr.mxu0 %v1026_v0  ;;  %v328_v12 = vld [vmem:[#allocation5 + $0x20] sm:$0xff]  ;;  %v327_v13 = vld [vmem:[#allocation5 + $0x18] sm:$0xff]  ;;  %v326_v14 = vld [vmem:[#allocation5 + $0x10] sm:$0xff]  ;;  %vm414_vm1 = vcmp.lt.s32.totalorder %v1225_v23, 48  ;;  %vm534_vm3 = vcmp.lt.s32.totalorder %v1225_v23, 24  ;;  %p952_p11 = scmp.ne.s32.totalorder %s582_s19, %s951_s9  ;;  %s955_s18 = sshll.u32 %s1028_s28, 4  ;;  %s956_s18 = int_to_ptr.vmem [resolvable:$false] %s955_s18 }
  0x5c   : > { %729 = vmatpush3.msra.mxu0 %v338_v2  ;;  %v325_v15 = vld [vmem:[#allocation5 + $0x8] sm:$0xff]  ;;  %v324_v16 = vld [vmem:[#allocation5] sm:$0xff]  ;;  %v323_v17 = vld [vmem:[%s1193_s4] sm:$0xff]  ;;  %v682_v26 = vsel %vm414_vm1, 1.0, %v1026_v0  ;;  %v685_v59 = vsel %vm534_vm3, 1.0, %v1026_v0  ;;  %s1262_s4 = scalar_lea.hbm %s1306_s7, %s689_s17  ;;  %s957_s10 = scalar_lea.vmem %s956_s18, 256 }
  0x5d   : > { %730 = vmatprep.subr.mxu0 %v1026_v0  ;;  %v461_v20 = vld [vmem:[#allocation7 + $0x78] sm:$0xff]  ;;  %v460_v21 = vld [vmem:[#allocation7 + $0x70] sm:$0xff]  ;;  %v459_v30 = vld [vmem:[#allocation7 + $0x68] sm:$0xff]  ;;  %p953_p1 = pnand %p952_p11, %p1326_p0  ;;  %p958_p6 = scmp.lt.s32.totalorder %s582_s19, %s956_s18 }
  0x5e   : > { %731 = vmatpush3.msra.mxu0 %v337_v3  ;;  %762 = vmatpush3.msra.mxu1 %v461_v20  ;;  %v458_v31 = vld [vmem:[#allocation7 + $0x60] sm:$0xff]  ;;  %v457_v32 = vld [vmem:[#allocation7 + $0x58] sm:$0xff]  ;;  %v456_v33 = vld [vmem:[#allocation7 + $0x50] sm:$0xff]  ;;  %p959_p12 = scmp.lt.s32.totalorder %s957_s10, %s951_s9 }
  0x5f   : > { %732 = vmatprep.subr.mxu0 %v1026_v0  ;;  %763 = vmatprep.subr.mxu1 %v1026_v0  ;;  %v455_v34 = vld [vmem:[#allocation7 + $0x48] sm:$0xff]  ;;  %v454_v35 = vld [vmem:[#allocation7 + $0x40] sm:$0xff]  ;;  %v453_v36 = vld [vmem:[#allocation7 + $0x38] sm:$0xff]  ;;  %p954_p2 = pneg %p953_p1 }
  0x60   : > { %733 = vmatpush3.msra.mxu0 %v336_v4  ;;  %764 = vmatpush3.msra.mxu1 %v460_v21  ;;  %v452_v37 = vld [vmem:[#allocation7 + $0x30] sm:$0xff]  ;;  %v451_v38 = vld [vmem:[#allocation7 + $0x28] sm:$0xff]  ;;  %v450_v39 = vld [vmem:[#allocation7 + $0x20] sm:$0xff]  ;;  %p960_p7 = por %p959_p12, %p958_p6 }
  0x61   : > { %734 = vmatprep.subr.mxu0 %v1026_v0  ;;  %765 = vmatprep.subr.mxu1 %v1026_v0  ;;  %v449_v40 = vld [vmem:[#allocation7 + $0x18] sm:$0xff]  ;;  %v448_v41 = vld [vmem:[#allocation7 + $0x10] sm:$0xff]  ;;  %v447_v42 = vld [vmem:[#allocation7 + $0x8] sm:$0xff] }
  0x62   : > { %735 = vmatpush3.msra.mxu0 %v335_v5  ;;  %766 = vmatpush3.msra.mxu1 %v459_v30  ;;  %v446_v43 = vld [vmem:[#allocation7] sm:$0xff]  ;;  %v683_v48 = vld [vmem:[%s1301_s2] ss:$0 sm:$0xff]  ;;  %p961_p9 = pnand %p960_p7, %p954_p2 }
  0x63   : > { %736 = vmatprep.subr.mxu0 %v1026_v0  ;;  %767 = vmatprep.subr.mxu1 %v1026_v0  ;;  %v684_v50 = vld [vmem:[%s1302_s3] ss:$0 sm:$0xff] }
  0x64   : > { %737 = vmatpush3.msra.mxu0 %v334_v6  ;;  %768 = vmatpush3.msra.mxu1 %v458_v31  ;;  %v686_v4 = vld [vmem:[%s1304_s5] ss:$0 sm:$0xff] }
  0x65   : > { %738 = vmatprep.subr.mxu0 %v1026_v0  ;;  %769 = vmatprep.subr.mxu1 %v1026_v0 }
  0x66   : > { %739 = vmatpush3.msra.mxu0 %v333_v7  ;;  %770 = vmatpush3.msra.mxu1 %v457_v32 }
  0x67   : > { %740 = vmatprep.subr.mxu0 %v1026_v0  ;;  %771 = vmatprep.subr.mxu1 %v1026_v0 }
  0x68   : > { %741 = vmatpush3.msra.mxu0 %v332_v8  ;;  %772 = vmatpush3.msra.mxu1 %v456_v33 }
  0x69   : > { %742 = vmatprep.subr.mxu0 %v1026_v0  ;;  %773 = vmatprep.subr.mxu1 %v1026_v0 }
  0x6a   : > { %743 = vmatpush3.msra.mxu0 %v331_v9  ;;  %774 = vmatpush3.msra.mxu1 %v455_v34 }
  0x6b   : > { %744 = vmatprep.subr.mxu0 %v1026_v0  ;;  %775 = vmatprep.subr.mxu1 %v1026_v0 }
  0x6c   : > { %745 = vmatpush3.msra.mxu0 %v330_v10  ;;  %776 = vmatpush3.msra.mxu1 %v454_v35 }
  0x6d   : > { %746 = vmatprep.subr.mxu0 %v1026_v0  ;;  %777 = vmatprep.subr.mxu1 %v1026_v0 }
  0x6e   : > { %747 = vmatpush3.msra.mxu0 %v329_v11  ;;  %778 = vmatpush3.msra.mxu1 %v453_v36 }
  0x6f   : > { %748 = vmatprep.subr.mxu0 %v1026_v0  ;;  %779 = vmatprep.subr.mxu1 %v1026_v0 }
  0x70   : > { %749 = vmatpush3.msra.mxu0 %v328_v12  ;;  %780 = vmatpush3.msra.mxu1 %v452_v37 }
  0x71   : > { %750 = vmatprep.subr.mxu0 %v1026_v0  ;;  %781 = vmatprep.subr.mxu1 %v1026_v0 }
  0x72   : > { %751 = vmatpush3.msra.mxu0 %v327_v13  ;;  %782 = vmatpush3.msra.mxu1 %v451_v38 }
  0x73   : > { %752 = vmatprep.subr.mxu0 %v1026_v0  ;;  %783 = vmatprep.subr.mxu1 %v1026_v0 }
  0x74   : > { %753 = vmatpush3.msra.mxu0 %v326_v14  ;;  %784 = vmatpush3.msra.mxu1 %v450_v39 }
  0x75   : > { %754 = vmatprep.subr.mxu0 %v1026_v0  ;;  %785 = vmatprep.subr.mxu1 %v1026_v0 }
  0x76   : > { %755 = vmatpush3.msra.mxu0 %v325_v15  ;;  %786 = vmatpush3.msra.mxu1 %v449_v40 }
  0x77   : > { %756 = vmatprep.subr.mxu0 %v1026_v0  ;;  %787 = vmatprep.subr.mxu1 %v1026_v0 }
  0x78   : > { %757 = vmatpush3.msra.mxu0 %v324_v16  ;;  %788 = vmatpush3.msra.mxu1 %v448_v41 }
  0x79   : > { %759 = vmatmul.mubr.f32.vlgmr.msra.gmra.mxu0 %v323_v17  ;;  %789 = vmatprep.subr.mxu1 %v1026_v0 }
  0x7a   : > { %790 = vmatpush3.msra.mxu1 %v447_v42 }
  0x7b   : > { %791 = vmatprep.subr.mxu1 %v1026_v0  ;;  %v687_v0 = vld [vmem:[%s1305_s6] ss:$0 sm:$0xff] }
  0x7c   : > { %792 = vmatpush3.msra.mxu1 %v446_v43 }
 0x139   : > { %v406_v18 = vpop.f32.mrf.mxu0 }
 0x13a   : > { %417 = vadd.xlane.f32.xlu0 %v406_v18 }
 0x13b   : > { %v760_v19 = vpop.f32.mrf.mxu0 }
 0x1c3   : > { %v418_v24 = vpop.xlane.xlu0 %417 }
 0x1c4   : > { %v419_v25 = vmul.f32 0.020833334, %v418_v24 }
 0x1c6   : > { %v420_v27 = vsub.f32 %v406_v18, %v419_v25 }
 0x1c8   : > { %v421_v28 = vmul.f32 %v682_v26, %v420_v27 }
 0x1ca   : > { %v422_v29 = vmul.f32 %v421_v28, %v421_v28 }
 0x1cc   : > { %423 = vadd.xlane.f32.xlu0 %v422_v29 }
 0x255   : > { %v424_v44 = vpop.xlane.xlu0 %423 }
 0x256   : > { %v425_v45 = vmul.f32 0.020833334, %v424_v44 }
 0x258   : > { %v426_v46 = vadd.f32 1e-05, %v425_v45 }
 0x25a   : > { %867 = vrsqrt.f32 %v426_v46 }
 0x267   : > { %v868_v47 = vpop.eup %867 }
 0x268   : > { %v428_v49 = vmul.f32 %v868_v47, %v420_v27 }
 0x26a   : > { %v435_v51 = vmul.f32 %v683_v48, %v428_v49 }
 0x26c   : > { %v442_v52 = vadd.f32 %v684_v50, %v435_v51 }
 0x26e   : > { %vm443_vm2 = vcmp.ge.f32.partialorder %v442_v52, 0.0  ;;  %v444_v53 = vmul.f32 0.3, %v442_v52 }
 0x270   : > { %v445_v54 = vsel %vm443_vm2, %v442_v52, %v444_v53 }
 0x271   : > { %794 = vmatmul.mubr.f32.vlgmr.msra.gmra.mxu1 %v445_v54 }
 0x331   : > { %v528_v55 = vpop.f32.mrf.mxu1 }
 0x332   : > { %537 = vadd.xlane.f32.xlu1 %v528_v55 }
 0x333   : > { %v795_v56 = vpop.f32.mrf.mxu1 }
 0x3bb   : > { %v538_v57 = vpop.xlane.xlu1 %537 }
 0x3bc   : > { %v539_v58 = vmul.f32 0.041666668, %v538_v57 }
 0x3be   : > { %v540_v60 = vsub.f32 %v528_v55, %v539_v58 }
 0x3c0   : > { %v541_v61 = vmul.f32 %v685_v59, %v540_v60 }
 0x3c2   : > { %v542_v62 = vmul.f32 %v541_v61, %v541_v61 }
 0x3c4   : > { %543 = vadd.xlane.f32.xlu1 %v542_v62 }
 0x44d   : > { %v544_v63 = vpop.xlane.xlu1 %543 }
 0x44e   : > { %v545_v1 = vmul.f32 0.041666668, %v544_v63 }
 0x450   : > { %v546_v2 = vadd.f32 1e-05, %v545_v1 }
 0x452   : > { %869 = vrsqrt.f32 %v546_v2 }
 0x45f   : > { %v870_v3 = vpop.eup %869 }
 0x460   : > { %v548_v5 = vmul.f32 %v870_v3, %v540_v60 }
 0x462   : > { %v555_v6 = vmul.f32 %v686_v4, %v548_v5 }
 0x464   : > { %v562_v7 = vadd.f32 %v687_v0, %v555_v6 }
 0x466   : > { %vm563_vm4 = vcmp.ge.f32.partialorder %v562_v7, 0.0  ;;  %v564_v8 = vmul.f32 0.3, %v562_v7 }
 0x468   : > { %v565_v9 = vsel %vm563_vm4, %v562_v7, %v564_v8 }
 0x469   : > { %566 = vst [vmem:[%s322_s15] sm:$0xff] %v565_v9 }
 0x46a   : > { %964 = shalt.err (!%p961_p9)
}
 0x46b   : > { %s965_s20 = scalar_lea.hbm %s1262_s4, 128  ;;  %s969_s22 = scalar_lea.hbm %s1306_s7, 256 }
 0x46c   : > { %p966_p13 = scmp.ne.s32.totalorder %s1262_s4, %s965_s20  ;;  %p970_p4 = scmp.lt.s32.totalorder %s1262_s4, %s1306_s7 }
 0x46d   : > { %p971_p8 = scmp.lt.s32.totalorder %s969_s22, %s965_s20 }
 0x46e   : > { %p967_p5 = pnand %p966_p13, %p1326_p0 }
 0x46f   : > { %p972_p3 = por %p971_p8, %p970_p4 }
 0x470   : > { %p968_p10 = pneg %p967_p5 }
 0x472   : > { %p973_p11 = pnand %p972_p3, %p968_p10 }
 0x474   : > { %976 = shalt.err (!%p973_p11)
}
 0x475   : > { %806 = dma.vmem_to_hbm [thread:$0]  (%p1326_p0), %s582_s19, 128, %s1262_s4, %s568_s30  }
 0x476 PF: > { %s593_s17 = sand.u32 1, %s1007_s24   ;;  %p1327_p1 = scmp.ne.s32.totalorder %s1314_s8, 0 }
 0x477   : > { %p1328_p2 = scmp.ge.s32.totalorder %s1019_s27, 2  ;;  %s594_s15 = scalar_lea.sflag [#allocation4], %s593_s17 }
 0x479   : > { %p820_p6 = pnand %p1328_p2, %p1327_p1 }
 0x47b   : > { %p821_p12 = pneg %p820_p6 }
 0x47d   : > { %1002 = dma.done.wait (%p821_p12), %s594_s15, 128  }
 0x47e   : > { %1004 = vsyncadd (%p821_p12), %s594_s15, 4294967168  ;;  %p21_p7 = scmp.ge.s32.totalorder %s1141_s23, 4   ;;  %s1329_s24 = smov %s1011_s25 }
 0x47f   : > { %s1330_s25 = smov %s1015_s26  ;;  %s1331_s26 = smov %s1157_s12 }
 0x480   : > { %s1332_s27 = smov %s1141_s23  ;;  %23 = sbr.rel (!%p21_p7) target bundleno = 9 (0x9), region = 101 }
 0x485   :  { %599 = vsyncpa [#allocation3], 1 }
 0x486   :  { %601 = vsyncpa [#allocation3 + $0x1], 1 }
 0x487   :  { %602 = vsyncpa [#allocation6], 1 }
 0x488   :  { %603 = vsyncpa [#allocation4], 1 }
 0x489   :  { %605 = vsyncpa [#allocation4 + $0x1], 1 }

</bundles_post_ra>
